<compile_context>
chip_gen: v6e
topology: v6e:2x2x1
jax: 0.10.0
libtpu: 0.0.40
codegen_flags: <defaults>
</compile_context>

<pallas_src>
import jax
import jax.numpy as jnp
from jax.experimental import pallas as pl
from jax.experimental.pallas import tpu as pltpu


def _round_up(n, m):
    return ((n + m - 1) // m) * m


def _default_pack():
    """pack=8 targets the 256-wide MXU (v6e/v7x); pack=4 for 128-wide MXUs."""
    try:
        kind = jax.devices()[0].device_kind.lower()
    except Exception:
        return 8
    if any(v in kind for v in ("v2", "v3", "v4", "v5")):
        return 4
    return 8


def mlp_kernel(x_ref,
               w1_ref, b1_ref,
               w2_ref, b2_ref,
               w3_ref, b3_ref,
               w4_ref, b4_ref,
               o_ref):
    # Whole 4-layer chain per batch tile.  MXU matmuls accumulate in f32; bias add
    # and ReLU stay in f32 regardless of the storage dtype of the weights.
    cd = w1_ref.dtype  # MXU feed dtype (bf16 or f32)

    h = jnp.dot(x_ref[...].astype(cd), w1_ref[...],
                preferred_element_type=jnp.float32) + b1_ref[...]
    h = jnp.maximum(h, 0.0)

    h = jnp.dot(h.astype(cd), w2_ref[...],
                preferred_element_type=jnp.float32) + b2_ref[...]
    h = jnp.maximum(h, 0.0)

    h = jnp.dot(h.astype(cd), w3_ref[...],
                preferred_element_type=jnp.float32) + b3_ref[...]
    h = jnp.maximum(h, 0.0)

    h = jnp.dot(h.astype(cd), w4_ref[...],
                preferred_element_type=jnp.float32) + b4_ref[...]

    o_ref[...] = h.astype(o_ref.dtype)


def _pack_params(params, pack, dtype):
    """Block-diagonal weights + tiled biases so `pack` rows share one lane row."""
    packed = {}
    for i in range(1, 5):
        w = params[f"w{i}"].astype(dtype)          # (k, n)
        b = params[f"b{i}"].astype(jnp.float32)    # (1, n)
        k, n = w.shape
        wb = jnp.zeros((pack * k, pack * n), dtype)
        for p in range(pack):
            wb = wb.at[p * k:(p + 1) * k, p * n:(p + 1) * n].set(w)
        packed[f"w{i}"] = wb                       # (pack*k, pack*n)
        packed[f"b{i}"] = jnp.tile(b, (1, pack))   # (1, pack*n)
    return packed


def mlp_forward(x, params, *, tile_b=8192, pack=None, use_bf16=True):
    """x: (B, 21) float32.  params: (in,out) weights and (1,out) biases in f32.

    use_bf16=True feeds the MXU in bf16 (f32 accumulation/bias/ReLU); expect
    ~1e-2 relative deviation from a pure-f32 reference.  use_bf16=False is exact.
    """
    B, f_in = x.shape
    if pack is None:
        pack = _default_pack()
    compute_dtype = jnp.bfloat16 if use_bf16 else jnp.float32

    dims = [tuple(params[f"w{i}"].shape) for i in range(1, 5)]
    assert f_in == dims[0][0]
    n_out = dims[-1][1]

    pk = _pack_params(params, pack, compute_dtype)
    w1, b1 = pk["w1"], pk["b1"]
    w2, b2 = pk["w2"], pk["b2"]
    w3, b3 = pk["w3"], pk["b3"]
    w4, b4 = pk["w4"], pk["b4"]

    # --- pack rows: pad B only if needed (usually a no-op), then a free reshape ---
    B_pad = _round_up(B, pack)
    if B_pad != B:
        x = jnp.pad(x, ((0, B_pad - B), (0, 0)))
    Bp = B_pad // pack
    xp = x.reshape(Bp, pack * f_in)                # row-major view, no copy

    # --- batch tiling over packed rows (partial last block handled by Pallas) ---
    desired = max(8, ((tile_b // pack) // 8) * 8)  # packed-row tile, multiple of 8
    if Bp > desired:
        tile_p = desired
    elif Bp >= 256:
        # Keep >=2 grid steps so the "parallel" axis can use both v7x TensorCores.
        tile_p = _round_up(pl.cdiv(Bp, 2), 8)
    else:
        tile_p = Bp                                # single block == full extent
    n_tiles = pl.cdiv(Bp, tile_p)

    # Weights/biases: full-array blocks, constant index_map -> resident in VMEM.
    resident = lambda a: pl.BlockSpec(a.shape, lambda i, _nd=a.ndim: (0,) * _nd)

    flops = 2 * B * sum(k * n for (k, n) in dims)
    param_bytes = sum(int(pk[f"w{i}"].size) * pk[f"w{i}"].dtype.itemsize
                      + int(pk[f"b{i}"].size) * 4 for i in range(1, 5))
    bytes_accessed = int(B) * (f_in + n_out) * 4 + param_bytes

    out = pl.pallas_call(
        mlp_kernel,
        out_shape=jax.ShapeDtypeStruct((Bp, pack * n_out), jnp.float32),
        grid=(n_tiles,),
        in_specs=[pl.BlockSpec((tile_p, pack * f_in), lambda i: (i, 0)),
                  resident(w1), resident(b1),
                  resident(w2), resident(b2),
                  resident(w3), resident(b3),
                  resident(w4), resident(b4)],
        out_specs=pl.BlockSpec((tile_p, pack * n_out), lambda i: (i, 0)),
        compiler_params=pltpu.CompilerParams(
            dimension_semantics=("parallel",)),
        cost_estimate=pl.CostEstimate(flops=flops, transcendentals=0,
                                      bytes_accessed=bytes_accessed),
    )(xp, w1, b1, w2, b2, w3, b3, w4, b4)

    # Free row-major un-pack, then drop any pad rows.
    return out.reshape(Bp * pack, n_out)[:B]


def init_params(key):
    """Deterministic init mimicking nn.Linear (uniform(-1/sqrt(fan_in), 1/sqrt(fan_in)))."""
    dims = [(21, 32), (32, 32), (32, 16), (16, 7)]
    params = {}
    for i, (fan_in, fan_out) in enumerate(dims, start=1):
        key, kw, kb = jax.random.split(key, 3)
        bound = 1.0 / jnp.sqrt(jnp.float32(fan_in))
        # PyTorch weight is (out, in); store the transpose (in, out) for x @ W.
        w_pt = jax.random.uniform(kw, (fan_out, fan_in), jnp.float32, -bound, bound)
        b_pt = jax.random.uniform(kb, (fan_out,), jnp.float32, -bound, bound)
        params[f"w{i}"] = w_pt.T
        params[f"b{i}"] = b_pt.reshape(1, fan_out)
    return params


def reference_forward(x, params):
    h = x
    for i in range(1, 5):
        h = h @ params[f"w{i}"] + params[f"b{i}"]
        if i < 4:
            h = jnp.maximum(h, 0.0)
    return h


if __name__ == "__main__":
    key = jax.random.PRNGKey(0)
    params = init_params(key)

    # 1) Exact f32 path, pack=4, single tile.
    key, k1 = jax.random.split(key)
    x1 = jax.random.normal(k1, (64, 21), jnp.float32)
    out1 = jax.block_until_ready(
        mlp_forward(x1, params, use_bf16=False, pack=4, tile_b=64))
    ref1 = reference_forward(x1, params)
    assert out1.shape == (64, 7), out1.shape
    assert jnp.allclose(out1, ref1, atol=1e-5, rtol=1e-5), "f32 pack=4 mismatch"

    # 2) Exact f32 path, pack=4, 2 grid steps with a partial last block.
    key, k2 = jax.random.split(key)
    x2 = jax.random.normal(k2, (136, 21), jnp.float32)
    out2 = jax.block_until_ready(
        mlp_forward(x2, params, use_bf16=False, pack=4, tile_b=128))
    ref2 = reference_forward(x2, params)
    assert out2.shape == (136, 7), out2.shape
    assert jnp.allclose(out2, ref2, atol=1e-5, rtol=1e-5), "f32 multi-tile mismatch"

    # 3) Exact f32 path, pack=8 with batch not a multiple of pack (pad path).
    key, k3 = jax.random.split(key)
    x3 = jax.random.normal(k3, (30, 21), jnp.float32)
    out3 = jax.block_until_ready(
        mlp_forward(x3, params, use_bf16=False, pack=8))
    ref3 = reference_forward(x3, params)
    assert out3.shape == (30, 7), out3.shape
    assert jnp.allclose(out3, ref3, atol=1e-5, rtol=1e-5), "f32 pack=8 mismatch"

    # 4) Default fast path (bf16 MXU feeds, auto pack, large tile): loose tolerance.
    out4 = jax.block_until_ready(mlp_forward(x1, params))
    assert out4.shape == (64, 7), out4.shape
    assert jnp.allclose(out4, ref1, atol=1e-1, rtol=1e-1), "bf16 default mismatch"

    print("KERNEL_OK")
</pallas_src>

<mosaic_0001>
module attributes {stable_mosaic.version = 11 : i64} {
  func.func @mlp_kernel(%arg0: i32, %arg1: memref<16x84xf32, #tpu.memory_space<vmem>>, %arg2: memref<84x128xf32, #tpu.memory_space<vmem>>, %arg3: memref<1x128xf32, #tpu.memory_space<vmem>>, %arg4: memref<128x128xf32, #tpu.memory_space<vmem>>, %arg5: memref<1x128xf32, #tpu.memory_space<vmem>>, %arg6: memref<128x64xf32, #tpu.memory_space<vmem>>, %arg7: memref<1x64xf32, #tpu.memory_space<vmem>>, %arg8: memref<64x28xf32, #tpu.memory_space<vmem>>, %arg9: memref<1x28xf32, #tpu.memory_space<vmem>>, %arg10: memref<16x28xf32, #tpu.memory_space<vmem>>) attributes {dimension_semantics = [#tpu.dimension_semantics<parallel>], iteration_bounds = array<i64: 1>, scalar_prefetch = 0 : i64, scratch_operands = 0 : i64, tpu.core_type = #tpu.core_type<tc>, window_params = [{transform_indices = @transform_0, window_bounds = array<i64: 16, 84>}, {pipeline_mode = #tpu.pipeline_mode<synchronous>, transform_indices = @transform_1, window_bounds = array<i64: 84, 128>}, {pipeline_mode = #tpu.pipeline_mode<synchronous>, transform_indices = @transform_2, window_bounds = array<i64: 1, 128>}, {pipeline_mode = #tpu.pipeline_mode<synchronous>, transform_indices = @transform_3, window_bounds = array<i64: 128, 128>}, {pipeline_mode = #tpu.pipeline_mode<synchronous>, transform_indices = @transform_4, window_bounds = array<i64: 1, 128>}, {pipeline_mode = #tpu.pipeline_mode<synchronous>, transform_indices = @transform_5, window_bounds = array<i64: 128, 64>}, {pipeline_mode = #tpu.pipeline_mode<synchronous>, transform_indices = @transform_6, window_bounds = array<i64: 1, 64>}, {pipeline_mode = #tpu.pipeline_mode<synchronous>, transform_indices = @transform_7, window_bounds = array<i64: 64, 28>}, {pipeline_mode = #tpu.pipeline_mode<synchronous>, transform_indices = @transform_8, window_bounds = array<i64: 1, 28>}, {transform_indices = @transform_9, window_bounds = array<i64: 16, 28>}]} {
    %c0 = arith.constant 0 : index
    %c0_0 = arith.constant 0 : index
    %0 = vector.load %arg1[%c0, %c0_0] : memref<16x84xf32, #tpu.memory_space<vmem>>, vector<16x84xf32>
    %c0_1 = arith.constant 0 : index
    %c0_2 = arith.constant 0 : index
    %1 = vector.load %arg2[%c0_1, %c0_2] : memref<84x128xf32, #tpu.memory_space<vmem>>, vector<84x128xf32>
    %cst = arith.constant dense<0.000000e+00> : vector<16x128xf32>
    %2 = tpu.matmul %0, %1, %cst {dimension_numbers = #tpu.dot_dimension_numbers<[1], [0], [0], [1], [0, 0, 1, 1], [], []>} : vector<16x84xf32>, vector<84x128xf32>, vector<16x128xf32> -> vector<16x128xf32>
    %c0_3 = arith.constant 0 : index
    %c0_4 = arith.constant 0 : index
    %3 = vector.load %arg3[%c0_3, %c0_4] : memref<1x128xf32, #tpu.memory_space<vmem>>, vector<1x128xf32>
    %4 = vector.broadcast %3 : vector<1x128xf32> to vector<16x128xf32>
    %5 = arith.addf %2, %4 : vector<16x128xf32>
    %cst_5 = arith.constant 0.000000e+00 : f32
    %6 = vector.broadcast %cst_5 : f32 to vector<16x128xf32>
    %7 = arith.maximumf %5, %6 : vector<16x128xf32>
    %c0_6 = arith.constant 0 : index
    %c0_7 = arith.constant 0 : index
    %8 = vector.load %arg4[%c0_6, %c0_7] : memref<128x128xf32, #tpu.memory_space<vmem>>, vector<128x128xf32>
    %cst_8 = arith.constant dense<0.000000e+00> : vector<16x128xf32>
    %9 = tpu.matmul %7, %8, %cst_8 {dimension_numbers = #tpu.dot_dimension_numbers<[1], [0], [0], [1], [0, 0, 1, 1], [], []>} : vector<16x128xf32>, vector<128x128xf32>, vector<16x128xf32> -> vector<16x128xf32>
    %c0_9 = arith.constant 0 : index
    %c0_10 = arith.constant 0 : index
    %10 = vector.load %arg5[%c0_9, %c0_10] : memref<1x128xf32, #tpu.memory_space<vmem>>, vector<1x128xf32>
    %11 = vector.broadcast %10 : vector<1x128xf32> to vector<16x128xf32>
    %12 = arith.addf %9, %11 : vector<16x128xf32>
    %cst_11 = arith.constant 0.000000e+00 : f32
    %13 = vector.broadcast %cst_11 : f32 to vector<16x128xf32>
    %14 = arith.maximumf %12, %13 : vector<16x128xf32>
    %c0_12 = arith.constant 0 : index
    %c0_13 = arith.constant 0 : index
    %15 = vector.load %arg6[%c0_12, %c0_13] : memref<128x64xf32, #tpu.memory_space<vmem>>, vector<128x64xf32>
    %cst_14 = arith.constant dense<0.000000e+00> : vector<16x64xf32>
    %16 = tpu.matmul %14, %15, %cst_14 {dimension_numbers = #tpu.dot_dimension_numbers<[1], [0], [0], [1], [0, 0, 1, 1], [], []>} : vector<16x128xf32>, vector<128x64xf32>, vector<16x64xf32> -> vector<16x64xf32>
    %c0_15 = arith.constant 0 : index
    %c0_16 = arith.constant 0 : index
    %17 = vector.load %arg7[%c0_15, %c0_16] : memref<1x64xf32, #tpu.memory_space<vmem>>, vector<1x64xf32>
    %18 = vector.broadcast %17 : vector<1x64xf32> to vector<16x64xf32>
    %19 = arith.addf %16, %18 : vector<16x64xf32>
    %cst_17 = arith.constant 0.000000e+00 : f32
    %20 = vector.broadcast %cst_17 : f32 to vector<16x64xf32>
    %21 = arith.maximumf %19, %20 : vector<16x64xf32>
    %c0_18 = arith.constant 0 : index
    %c0_19 = arith.constant 0 : index
    %22 = vector.load %arg8[%c0_18, %c0_19] : memref<64x28xf32, #tpu.memory_space<vmem>>, vector<64x28xf32>
    %cst_20 = arith.constant dense<0.000000e+00> : vector<16x28xf32>
    %23 = tpu.matmul %21, %22, %cst_20 {dimension_numbers = #tpu.dot_dimension_numbers<[1], [0], [0], [1], [0, 0, 1, 1], [], []>} : vector<16x64xf32>, vector<64x28xf32>, vector<16x28xf32> -> vector<16x28xf32>
    %c0_21 = arith.constant 0 : index
    %c0_22 = arith.constant 0 : index
    %24 = vector.load %arg9[%c0_21, %c0_22] : memref<1x28xf32, #tpu.memory_space<vmem>>, vector<1x28xf32>
    %25 = vector.broadcast %24 : vector<1x28xf32> to vector<16x28xf32>
    %26 = arith.addf %23, %25 : vector<16x28xf32>
    %c0_23 = arith.constant 0 : index
    %c0_24 = arith.constant 0 : index
    %27 = vector.load %arg10[%c0_23, %c0_24] : memref<16x28xf32, #tpu.memory_space<vmem>>, vector<16x28xf32>
    tpu.vector_store %arg10[%c0_23, %c0_24], %26 {strides = array<i32>} : memref<16x28xf32, #tpu.memory_space<vmem>>, vector<16x28xf32>,
    return
  }
  func.func @transform_0(%arg0: i32) -> (i32, i32) {
    %c0_i32 = arith.constant 0 : i32
    %c0_i32_0 = arith.constant 0 : i32
    return %arg0, %c0_i32 : i32, i32
  }
  func.func @transform_1(%arg0: i32) -> (i32, i32) {
    %c0_i32 = arith.constant 0 : i32
    %c0_i32_0 = arith.constant 0 : i32
    %c0_i32_1 = arith.constant 0 : i32
    return %c0_i32, %c0_i32_0 : i32, i32
  }
  func.func @transform_2(%arg0: i32) -> (i32, i32) {
    %c0_i32 = arith.constant 0 : i32
    %c0_i32_0 = arith.constant 0 : i32
    %c0_i32_1 = arith.constant 0 : i32
    return %c0_i32, %c0_i32_0 : i32, i32
  }
  func.func @transform_3(%arg0: i32) -> (i32, i32) {
    %c0_i32 = arith.constant 0 : i32
    %c0_i32_0 = arith.constant 0 : i32
    %c0_i32_1 = arith.constant 0 : i32
    return %c0_i32, %c0_i32_0 : i32, i32
  }
  func.func @transform_4(%arg0: i32) -> (i32, i32) {
    %c0_i32 = arith.constant 0 : i32
    %c0_i32_0 = arith.constant 0 : i32
    %c0_i32_1 = arith.constant 0 : i32
    return %c0_i32, %c0_i32_0 : i32, i32
  }
  func.func @transform_5(%arg0: i32) -> (i32, i32) {
    %c0_i32 = arith.constant 0 : i32
    %c0_i32_0 = arith.constant 0 : i32
    %c0_i32_1 = arith.constant 0 : i32
    return %c0_i32, %c0_i32_0 : i32, i32
  }
  func.func @transform_6(%arg0: i32) -> (i32, i32) {
    %c0_i32 = arith.constant 0 : i32
    %c0_i32_0 = arith.constant 0 : i32
    %c0_i32_1 = arith.constant 0 : i32
    return %c0_i32, %c0_i32_0 : i32, i32
  }
  func.func @transform_7(%arg0: i32) -> (i32, i32) {
    %c0_i32 = arith.constant 0 : i32
    %c0_i32_0 = arith.constant 0 : i32
    %c0_i32_1 = arith.constant 0 : i32
    return %c0_i32, %c0_i32_0 : i32, i32
  }
  func.func @transform_8(%arg0: i32) -> (i32, i32) {
    %c0_i32 = arith.constant 0 : i32
    %c0_i32_0 = arith.constant 0 : i32
    %c0_i32_1 = arith.constant 0 : i32
    return %c0_i32, %c0_i32_0 : i32, i32
  }
  func.func @transform_9(%arg0: i32) -> (i32, i32) {
    %c0_i32 = arith.constant 0 : i32
    %c0_i32_0 = arith.constant 0 : i32
    return %arg0, %c0_i32 : i32, i32
  }
}

</mosaic_0001>

<bundles_post_ra>
// kernel: tpu_custom_call.1
= control target key start
LH: loop header
LB: loop body
LE: loop exit
PB: predicated region body
PF: predicated region fallthrough
CT: control target
= control target key end

     0   :  { %14 = vsyncpa [#allocation3], 0  ;;  %s930_s0 = inlined_call_operand.vmem [shape: f32[16,84], index: 0, kind: input, shape index: {}]   ;;  %s931_s1 = inlined_call_operand.vmem [shape: f32[84,128], index: 1, kind: input, shape index: {}]   ;;  %s932_s2 = inlined_call_operand.vmem [shape: f32[1,128], index: 2, kind: input, shape index: {}]   ;;  %s933_s3 = inlined_call_operand.vmem [shape: f32[128,128], index: 3, kind: input, shape index: {}]   ;;  %s934_s4 = inlined_call_operand.hbm [shape: f32[1,128], index: 4, kind: input, shape index: {}]   ;;  %s935_s5 = inlined_call_operand.vmem [shape: f32[128,64], index: 5, kind: input, shape index: {}]   ;;  %s936_s6 = inlined_call_operand.vmem [shape: f32[1,64], index: 6, kind: input, shape index: {}]   ;;  %s937_s7 = inlined_call_operand.vmem [shape: f32[64,28], index: 7, kind: input, shape index: {}]   ;;  %s938_s8 = inlined_call_operand.vmem [shape: f32[1,28], index: 8, kind: input, shape index: {}]   ;;  %s939_s9 = inlined_call_operand.hbm [shape: f32[16,28], index: 9, kind: output, shape index: {}]  }
   0x1   :  { %15 = vsyncpa [#allocation4], 0  ;;  %s700_s30 = smov [#allocation2]  }
   0x2   :  { %s30_s10 = sshll.u32 %s700_s30, 4  ;;  %s31_s10 = int_to_ptr.vmem [resolvable:$true] %s30_s10 }
   0x3   :  { %s664_s11 = scalar_lea.vmem %s31_s10, 16  ;;  %s668_s12 = scalar_lea.vmem %s31_s10, 32 }
   0x4   :  { %p665_p0 = scmp.ne.s32.totalorder %s31_s10, %s664_s11  ;;  %p669_p1 = scmp.lt.s32.totalorder %s31_s10, %s31_s10 }
   0x5   :  { %p670_p2 = scmp.lt.s32.totalorder %s668_s12, %s664_s11 }
   0x7   :  { %p671_p3 = por %p670_p2, %p669_p1 }
   0x9   :  { %p672_p4 = pnand %p671_p3, %p665_p0 }
   0xb   :  { %675 = shalt.err (!%p672_p4)
}
   0xc   :  { %33 = dma.hbm_to_vmem [thread:$0]  %s934_s4, 16, %s31_s10, [#allocation3]  }
   0xd   :  { %696 = dma.done.wait [#allocation3], 16  }
   0xe   :  { %697 = vsyncadd [#allocation3], 4294967280  ;;  %vm72_vm0 = vcmask 1043456   ;;  %v57_v0 = vld [vmem:[%s931_s1 + $0x50] sm:$0xf]  ;;  %v56_v1 = vld [vmem:[%s931_s1 + $0x48] sm:$0xff] }
   0xf   :  { %538 = vmatprep.subr.msk.mxu0 %vm72_vm0, %v57_v0  ;;  %vm65_vm1 = vcmask 687104   ;;  %v55_v2 = vld [vmem:[%s931_s1 + $0x40] sm:$0xff]  ;;  %v54_v4 = vld [vmem:[%s931_s1 + $0x38] sm:$0xff]  ;;  %v167_v6 = vld [vmem:[%s933_s3 + $0x70] sm:$0xff]  ;;  %vm368_vm2 = vcmask 523264   ;;  %vm450_vm3 = vcmask 228352  }
  0x10   :  { %539 = vmatpush3.msk.msra.mxu0 %vm72_vm0, %v57_v0  ;;  %v45_v3 = vld [vmem:[%s930_s0] sm:$0xff]  ;;  %v168_v5 = vld [vmem:[%s933_s3 + $0x78] sm:$0xff]  ;;  %v53_v7 = vld [vmem:[%s931_s1 + $0x30] sm:$0xff] }
  0x11   :  { %540 = vmatprep.subr.mxu0 %v56_v1  ;;  %560 = vmatprep.mubr.msk.f32.mxu0 %vm65_vm1, %v45_v3  ;;  %v166_v8 = vld [vmem:[%s933_s3 + $0x68] sm:$0xff]  ;;  %v165_v10 = vld [vmem:[%s933_s3 + $0x60] sm:$0xff]  ;;  %v164_v12 = vld [vmem:[%s933_s3 + $0x58] sm:$0xff] }
  0x12   :  { %541 = vmatpush3.msra.mxu0 %v56_v1  ;;  %563 = vmatprep.subr.mxu1 %v168_v5  ;;  %v52_v9 = vld [vmem:[%s931_s1 + $0x28] sm:$0xff]  ;;  %v51_v11 = vld [vmem:[%s931_s1 + $0x20] sm:$0xff]  ;;  %v50_v13 = vld [vmem:[%s931_s1 + $0x18] sm:$0xff] }
  0x13   :  { %542 = vmatprep.subr.mxu0 %v55_v2  ;;  %564 = vmatpush3.msra.mxu1 %v168_v5  ;;  %v163_v14 = vld [vmem:[%s933_s3 + $0x50] sm:$0xff]  ;;  %v162_v16 = vld [vmem:[%s933_s3 + $0x48] sm:$0xff]  ;;  %v161_v18 = vld [vmem:[%s933_s3 + $0x40] sm:$0xff] }
  0x14   :  { %543 = vmatpush3.msra.mxu0 %v55_v2  ;;  %565 = vmatprep.subr.mxu1 %v167_v6  ;;  %v49_v15 = vld [vmem:[%s931_s1 + $0x10] sm:$0xff]  ;;  %v48_v17 = vld [vmem:[%s931_s1 + $0x8] sm:$0xff]  ;;  %v47_v19 = vld [vmem:[%s931_s1] sm:$0xff] }
  0x15   :  { %544 = vmatprep.subr.mxu0 %v54_v4  ;;  %566 = vmatpush3.msra.mxu1 %v167_v6  ;;  %v160_v20 = vld [vmem:[%s933_s3 + $0x38] sm:$0xff]  ;;  %v46_v21 = vld [vmem:[%s930_s0 + $0x8] sm:$0xff]  ;;  %v159_v22 = vld [vmem:[%s933_s3 + $0x30] sm:$0xff] }
  0x16   :  { %545 = vmatpush3.msra.mxu0 %v54_v4  ;;  %567 = vmatprep.subr.mxu1 %v166_v8  ;;  %v158_v23 = vld [vmem:[%s933_s3 + $0x28] sm:$0xff]  ;;  %v157_v24 = vld [vmem:[%s933_s3 + $0x20] sm:$0xff]  ;;  %v156_v25 = vld [vmem:[%s933_s3 + $0x18] sm:$0xff] }
  0x17   :  { %546 = vmatprep.subr.mxu0 %v53_v7  ;;  %568 = vmatpush3.msra.mxu1 %v166_v8  ;;  %v155_v26 = vld [vmem:[%s933_s3 + $0x10] sm:$0xff]  ;;  %v154_v27 = vld [vmem:[%s933_s3 + $0x8] sm:$0xff]  ;;  %v153_v28 = vld [vmem:[%s933_s3] sm:$0xff] }
  0x18   :  { %547 = vmatpush3.msra.mxu0 %v53_v7  ;;  %569 = vmatprep.subr.mxu1 %v165_v10  ;;  %v268_v29 = vld [vmem:[%s935_s5 + $0x78] sm:$0xff]  ;;  %v267_v30 = vld [vmem:[%s935_s5 + $0x70] sm:$0xff]  ;;  %v266_v31 = vld [vmem:[%s935_s5 + $0x68] sm:$0xff] }
  0x19   :  { %548 = vmatprep.subr.mxu0 %v52_v9  ;;  %570 = vmatpush3.msra.mxu1 %v165_v10  ;;  %v265_v32 = vld [vmem:[%s935_s5 + $0x60] sm:$0xff]  ;;  %v264_v33 = vld [vmem:[%s935_s5 + $0x58] sm:$0xff]  ;;  %v263_v34 = vld [vmem:[%s935_s5 + $0x50] sm:$0xff] }
  0x1a   :  { %549 = vmatpush3.msra.mxu0 %v52_v9  ;;  %571 = vmatprep.subr.mxu1 %v164_v12  ;;  %v262_v35 = vld [vmem:[%s935_s5 + $0x48] sm:$0xff]  ;;  %v261_v36 = vld [vmem:[%s935_s5 + $0x40] sm:$0xff]  ;;  %v260_v37 = vld [vmem:[%s935_s5 + $0x38] sm:$0xff] }
  0x1b   :  { %550 = vmatprep.subr.mxu0 %v51_v11  ;;  %572 = vmatpush3.msra.mxu1 %v164_v12  ;;  %v259_v38 = vld [vmem:[%s935_s5 + $0x30] sm:$0xff]  ;;  %v258_v39 = vld [vmem:[%s935_s5 + $0x28] sm:$0xff]  ;;  %v257_v40 = vld [vmem:[%s935_s5 + $0x20] sm:$0xff] }
  0x1c   :  { %551 = vmatpush3.msra.mxu0 %v51_v11  ;;  %573 = vmatprep.subr.mxu1 %v163_v14  ;;  %v470_v41 = vld [vmem:[%s932_s2] ss:$0 sm:$0xff]  ;;  %v256_v48 = vld [vmem:[%s935_s5 + $0x18] sm:$0xff]  ;;  %v255_v49 = vld [vmem:[%s935_s5 + $0x10] sm:$0xff] }
  0x1d   :  { %552 = vmatprep.subr.mxu0 %v50_v13  ;;  %574 = vmatpush3.msra.mxu1 %v163_v14  ;;  %v254_v50 = vld [vmem:[%s935_s5 + $0x8] sm:$0xff]  ;;  %v253_v51 = vld [vmem:[%s935_s5] sm:$0xff]  ;;  %v360_v52 = vld [vmem:[%s937_s7 + $0x38] sm:$0xff] }
  0x1e   :  { %553 = vmatpush3.msra.mxu0 %v50_v13  ;;  %575 = vmatprep.subr.mxu1 %v162_v16  ;;  %v359_v53 = vld [vmem:[%s937_s7 + $0x30] sm:$0xff]  ;;  %v358_v54 = vld [vmem:[%s937_s7 + $0x28] sm:$0xff]  ;;  %v357_v55 = vld [vmem:[%s937_s7 + $0x20] sm:$0xff] }
  0x1f   :  { %554 = vmatprep.subr.mxu0 %v49_v15  ;;  %576 = vmatpush3.msra.mxu1 %v162_v16  ;;  %v474_v56 = vld [vmem:[#allocation2] ss:$0 sm:$0xff]  ;;  %v356_v63 = vld [vmem:[%s937_s7 + $0x18] sm:$0xff]  ;;  %v355_v0 = vld [vmem:[%s937_s7 + $0x10] sm:$0xff] }
  0x20   :  { %555 = vmatpush3.msra.mxu0 %v49_v15  ;;  %577 = vmatprep.subr.mxu1 %v161_v18  ;;  %v354_v1 = vld [vmem:[%s937_s7 + $0x8] sm:$0xff]  ;;  %v353_v2 = vld [vmem:[%s937_s7] sm:$0xff]  ;;  %s701_s7 = smov [#allocation5]  }
  0x21   :  { %556 = vmatprep.subr.mxu0 %v48_v17  ;;  %578 = vmatpush3.msra.mxu1 %v161_v18  ;;  %v475_v3 = vld [vmem:[%s936_s6] ss:$0 sm:$0xff]  ;;  %s458_s28 = sshll.u32 %s701_s7, 4  ;;  %s459_s28 = int_to_ptr.vmem [resolvable:$true] %s458_s28 }
  0x22   :  { %557 = vmatpush3.msra.mxu0 %v48_v17  ;;  %579 = vmatprep.subr.mxu1 %v160_v20  ;;  %v476_v10 = vld [vmem:[%s938_s8] ss:$0 sm:$0xff]  ;;  %s676_s6 = scalar_lea.vmem %s459_s28, 256  ;;  %p681_p6 = scmp.lt.s32.totalorder %s459_s28, %s459_s28 }
  0x23   :  { %558 = vmatprep.subr.mxu0 %v47_v19  ;;  %580 = vmatpush3.msra.mxu1 %v160_v20  ;;  %p677_p5 = scmp.ne.s32.totalorder %s459_s28, %s676_s6  ;;  %p682_p7 = scmp.lt.s32.totalorder %s676_s6, %s676_s6 }
  0x24   :  { %559 = vmatpush3.msra.mxu0 %v47_v19  ;;  %581 = vmatprep.subr.mxu1 %v159_v22 }
  0x25   :  { %561 = vmatmul.mubr.msk.f32.vlgmr.msra.gmra.mxu0 %vm65_vm1, %v46_v21  ;;  %582 = vmatpush3.msra.mxu1 %v159_v22  ;;  %p683_p8 = por %p682_p7, %p681_p6 }
  0x26   :  { %583 = vmatprep.subr.mxu1 %v158_v23  ;;  %598 = vmatprep.subr.mxu0 %v268_v29 }
  0x27   :  { %584 = vmatpush3.msra.mxu1 %v158_v23  ;;  %599 = vmatpush3.msra.mxu0 %v268_v29  ;;  %p684_p9 = pnand %p683_p8, %p677_p5 }
  0x28   :  { %585 = vmatprep.subr.mxu1 %v157_v24  ;;  %600 = vmatprep.subr.mxu0 %v267_v30 }
  0x29   :  { %586 = vmatpush3.msra.mxu1 %v157_v24  ;;  %601 = vmatpush3.msra.mxu0 %v267_v30 }
  0x2a   :  { %587 = vmatprep.subr.mxu1 %v156_v25  ;;  %602 = vmatprep.subr.mxu0 %v266_v31 }
  0x2b   :  { %588 = vmatpush3.msra.mxu1 %v156_v25  ;;  %603 = vmatpush3.msra.mxu0 %v266_v31 }
  0x2c   :  { %589 = vmatprep.subr.mxu1 %v155_v26  ;;  %604 = vmatprep.subr.mxu0 %v265_v32 }
  0x2d   :  { %590 = vmatpush3.msra.mxu1 %v155_v26  ;;  %605 = vmatpush3.msra.mxu0 %v265_v32 }
  0x2e   :  { %591 = vmatprep.subr.mxu1 %v154_v27  ;;  %606 = vmatprep.subr.mxu0 %v264_v33 }
  0x2f   :  { %592 = vmatpush3.msra.mxu1 %v154_v27  ;;  %607 = vmatpush3.msra.mxu0 %v264_v33 }
  0x30   :  { %593 = vmatprep.subr.mxu1 %v153_v28  ;;  %608 = vmatprep.subr.mxu0 %v263_v34 }
  0x31   :  { %594 = vmatpush3.msra.mxu1 %v153_v28  ;;  %609 = vmatpush3.msra.mxu0 %v263_v34 }
  0x32   :  { %610 = vmatprep.subr.mxu0 %v262_v35  ;;  %633 = vmatprep.subr.mxu1 %v360_v52 }
  0x33   :  { %611 = vmatpush3.msra.mxu0 %v262_v35 }
  0x34   :  { %612 = vmatprep.subr.mxu0 %v261_v36 }
  0x35   :  { %613 = vmatpush3.msra.mxu0 %v261_v36 }
  0x36   :  { %614 = vmatprep.subr.mxu0 %v260_v37 }
  0x37   :  { %615 = vmatpush3.msra.mxu0 %v260_v37 }
  0x38   :  { %616 = vmatprep.subr.mxu0 %v259_v38 }
  0x39   :  { %617 = vmatpush3.msra.mxu0 %v259_v38 }
  0x3a   :  { %618 = vmatprep.subr.mxu0 %v258_v39 }
  0x3b   :  { %619 = vmatpush3.msra.mxu0 %v258_v39 }
  0x3c   :  { %620 = vmatprep.subr.mxu0 %v257_v40 }
  0x3d   :  { %621 = vmatpush3.msra.mxu0 %v257_v40 }
  0x3e   :  { %622 = vmatprep.subr.mxu0 %v256_v48 }
  0x3f   :  { %623 = vmatpush3.msra.mxu0 %v256_v48 }
  0x40   :  { %624 = vmatprep.subr.mxu0 %v255_v49 }
  0x41   :  { %625 = vmatpush3.msra.mxu0 %v255_v49 }
  0x42   :  { %626 = vmatprep.subr.mxu0 %v254_v50 }
  0x43   :  { %627 = vmatpush3.msra.mxu0 %v254_v50 }
  0x44   :  { %628 = vmatprep.subr.mxu0 %v253_v51 }
  0x45   :  { %629 = vmatpush3.msra.mxu0 %v253_v51 }
  0xe5   :  { %v562_v42 = vpop.f32.mrf.mxu0 }
  0xe6   :  { %v148_v43 = vadd.f32 %v562_v42, %v470_v41 }
  0xe7   :  { %v142_v44 = vpop.f32.mrf.mxu0 }
  0xe8   :  { %v143_v45 = vadd.f32 %v470_v41, %v142_v44  ;;  %v152_v47 = vmax.f32 %v148_v43, 0.0 }
  0xea   :  { %v151_v46 = vmax.f32 %v143_v45, 0.0 }
  0xec   :  { %595 = vmatprep.mubr.f32.mxu1 %v151_v46 }
  0xed   :  { %596 = vmatmul.mubr.f32.vlgmr.msra.gmra.mxu1 %v152_v47 }
  0xee   :  { %634 = vmatpush3.msra.mxu1 %v360_v52 }
  0xef   :  { %635 = vmatprep.subr.mxu1 %v359_v53 }
  0xf0   :  { %636 = vmatpush3.msra.mxu1 %v359_v53 }
  0xf1   :  { %637 = vmatprep.subr.mxu1 %v358_v54 }
  0xf2   :  { %638 = vmatpush3.msra.mxu1 %v358_v54 }
  0xf3   :  { %639 = vmatprep.subr.mxu1 %v357_v55 }
  0xf4   :  { %640 = vmatpush3.msra.mxu1 %v357_v55 }
  0xf5   :  { %641 = vmatprep.subr.mxu1 %v356_v63 }
  0xf6   :  { %642 = vmatpush3.msra.mxu1 %v356_v63 }
  0xf7   :  { %643 = vmatprep.subr.mxu1 %v355_v0 }
  0xf8   :  { %644 = vmatpush3.msra.mxu1 %v355_v0 }
  0xf9   :  { %645 = vmatprep.subr.mxu1 %v354_v1 }
  0xfa   :  { %646 = vmatpush3.msra.mxu1 %v354_v1 }
  0xfb   :  { %647 = vmatprep.subr.mxu1 %v353_v2 }
  0xfc   :  { %648 = vmatpush3.msra.mxu1 %v353_v2 }
 0x1ad   :  { %v597_v57 = vpop.f32.mrf.mxu1 }
 0x1ae   :  { %v248_v58 = vadd.f32 %v597_v57, %v474_v56 }
 0x1af   :  { %v242_v59 = vpop.f32.mrf.mxu1 }
 0x1b0   :  { %v243_v60 = vadd.f32 %v474_v56, %v242_v59  ;;  %v252_v62 = vmax.f32 %v248_v58, 0.0 }
 0x1b2   :  { %v251_v61 = vmax.f32 %v243_v60, 0.0 }
 0x1b4   :  { %630 = vmatprep.mubr.f32.mxu0 %v251_v61 }
 0x1b5   :  { %631 = vmatmul.mubr.f32.vlgmr.msra.gmra.mxu0 %v252_v62 }
 0x275   :  { %v632_v4 = vpop.f32.mrf.mxu0 }
 0x276   :  { %v348_v5 = vadd.f32 %v632_v4, %v475_v3 }
 0x277   :  { %v342_v6 = vpop.f32.mrf.mxu0 }
 0x278   :  { %v343_v7 = vadd.f32 %v475_v3, %v342_v6  ;;  %v352_v9 = vmax.f32 %v348_v5, 0.0 }
 0x27a   :  { %v351_v8 = vmax.f32 %v343_v7, 0.0 }
 0x27c   :  { %649 = vmatprep.mubr.msk.f32.mxu1 %vm368_vm2, %v351_v8 }
 0x27d   :  { %650 = vmatmul.mubr.msk.f32.vlgmr.msra.gmra.mxu1 %vm368_vm2, %v352_v9 }
 0x33d   :  { %v651_v11 = vpop.f32.mrf.mxu1 }
 0x33e   :  { %v447_v12 = vadd.f32 %v651_v11, %v476_v10 }
 0x33f   :  { %v441_v13 = vpop.f32.mrf.mxu1 }
 0x340   :  { %452 = vst.msk [vmem:[#allocation5 + $0x8] sm:$0xff] %vm450_vm3, %v447_v12  ;;  %v442_v14 = vadd.f32 %v476_v10, %v441_v13 }
 0x342   :  { %451 = vst.msk [vmem:[#allocation5] sm:$0xff] %vm450_vm3, %v442_v14 }
 0x343   :  { %687 = shalt.err (!%p684_p9)
}
 0x344   :  { %s702_s29 = smov 128   ;;  %s703_s30 = smov 8  }
 0x345   :  { %464 = dma.vmem_to_hbm [thread:$0]  %s459_s28, 256, %s939_s9, [#allocation4], %s702_s29, %s702_s29, %s703_s30  }
 0x346   :  { %698 = dma.done.wait [#allocation4], 256  }
 0x347   :  { %699 = vsyncadd [#allocation4], 4294967040 }
 0x348   :  { %468 = vsyncpa [#allocation3], 1 }
 0x349   :  { %469 = vsyncpa [#allocation4], 1 }

</bundles_post_ra>
